<compile_context>
chip_gen: v5e
topology: v5e:2x2
jax: 0.10.0
libtpu: 0.0.40
codegen_flags: <defaults>
</compile_context>

<pallas_src>
import math
import jax
import jax.numpy as jnp
from jax.experimental import pallas as pl
from jax.experimental.pallas import tpu as pltpu

IN_DIM = 3
IN_PAD = 8            # input features padded to one sublane tile (MXU layer 1)
HIDDEN = 100
HPAD = 128            # hidden padded to one lane tile
EPS = 1e-5


def _mlp_kernel(xt_ref, w1t_ref, b1_ref, w2t_ref, b2_ref, w3_ref, b3_ref, o_ref):
    """One batch tile, batch laid out along lanes.

    xt_ref : (IN_PAD, TB) f32    x^T tile, rows 3..7 zero
    w1t_ref: (HPAD, IN_PAD) bf16 layer-1 weight (out, in), BN1 scale folded in
    b1_ref : (HPAD, 1) f32       BN1 shift
    w2t_ref: (HPAD, HPAD) bf16   layer-2 weight (out, in), BN2 scale folded in
    b2_ref : (HPAD, 1) f32       BN2 shift
    w3_ref : (HPAD, 1) f32       final Linear weight column
    b3_ref : (1, 1) f32          final Linear bias (SMEM scalar)
    o_ref  : (1, TB) f32         sigmoid output, lane-dense
    """
    # Layer 1 on the MXU (K padded 3 -> 8), f32 accumulate.
    xt = xt_ref[...].astype(jnp.bfloat16)                               # (IN_PAD, TB)
    h = jnp.dot(w1t_ref[...], xt, preferred_element_type=jnp.float32)   # (HPAD, TB)
    h = jnp.maximum(h + b1_ref[...], 0.0)                               # BN1 shift + ReLU (Dropout=id)
    # Layer 2 on the MXU.
    h = jnp.dot(w2t_ref[...], h.astype(jnp.bfloat16),
                preferred_element_type=jnp.float32)                     # (HPAD, TB)
    h = jnp.maximum(h + b2_ref[...], 0.0)                               # BN2 shift + ReLU
    # Layer 3 (N=1): VPU multiply + sublane reduction (1-row MXU op would idle
    # most of the array).
    y = jnp.sum(h * w3_ref[...], axis=0, keepdims=True)                 # (1, TB)
    o_ref[...] = jax.nn.sigmoid(y + b3_ref[0, 0])


def _round_up(n, m):
    return ((n + m - 1) // m) * m


def _choose_tile(batch, block_b):
    """Lane-aligned batch tile; prefer >= 2 grid steps (v7x megacore)."""
    b_pad = _round_up(batch, 128)
    tb = min(block_b, b_pad)
    if tb == b_pad and b_pad > 128:
        # whole batch would be a single tile -> split so both TCs get work
        tb = _round_up(-(-batch // 2), 128)
    return tb


def selector_network_forward(x, kernel_params, *, block_b=8192):
    """x: (B, 3) float32 -> (B, 1) float32 (eval-mode SelectorNetwork.forward)."""
    w1t, b1, w2t, b2, w3c, b3 = kernel_params
    B = x.shape[0]
    tb = _choose_tile(B, block_b)
    num_tiles = pl.cdiv(B, tb)

    # Batch along lanes; features padded 3 -> 8 so layer 1 can use the MXU.
    # (Keep the transpose on the host: a (tb, 3) kernel-side layout would pad
    #  the 3-wide lane dim to 128 in VMEM and wreck DMA efficiency.)
    xt = jnp.pad(jnp.transpose(x), ((0, IN_PAD - IN_DIM), (0, 0)))      # (8, B)

    def const(shape):
        return pl.BlockSpec(shape, lambda i, _n=len(shape): (0,) * _n)

    # Rough per-step VMEM: double-buffered x tile + double-buffered out row +
    # resident weights + ~4 live (HPAD, tb) f32 temporaries.  Clamp to a range
    # that is safe on every generation (v7x physical VMEM/TC = 64 MiB).
    vmem_est = (2 * IN_PAD * tb * 4 + 2 * tb * 4 + (1 << 20)
                + 4 * HPAD * tb * 4)
    vmem_limit = int(min(56 << 20, max(32 << 20, vmem_est)))

    out = pl.pallas_call(
        _mlp_kernel,
        out_shape=jax.ShapeDtypeStruct((1, num_tiles * tb), jnp.float32),
        grid=(num_tiles,),
        in_specs=[
            pl.BlockSpec((IN_PAD, tb), lambda i: (0, i)),               # x^T tile (pipelined)
            const((HPAD, IN_PAD)),                                      # w1t (resident, bf16)
            const((HPAD, 1)),                                           # b1
            const((HPAD, HPAD)),                                        # w2t (resident, bf16)
            const((HPAD, 1)),                                           # b2
            const((HPAD, 1)),                                           # w3
            pl.BlockSpec(memory_space=pltpu.MemorySpace.SMEM),          # b3 scalar
        ],
        out_specs=pl.BlockSpec((1, tb), lambda i: (0, i)),              # lane-dense row
        compiler_params=pltpu.CompilerParams(
            dimension_semantics=("parallel",),                          # 2 TCs on v7x
            vmem_limit_bytes=vmem_limit),
    )(xt, w1t, b1, w2t, b2, w3c, b3)
    # Lane-dense (1, num_tiles*tb) row -> (B, 1).  Padded tail lanes (which may
    # carry garbage pushed through sigmoid) are sliced off here.
    return out[0, :B].reshape(B, 1)


def _xavier_uniform(key, fan_in, fan_out):
    # torch.nn.init.xavier_uniform_ on a (out, in) weight; stored here (in, out).
    bound = math.sqrt(6.0 / (fan_in + fan_out))
    return jax.random.uniform(key, (fan_in, fan_out), jnp.float32, -bound, bound)


def init_raw_params(key):
    """PyTorch-equivalent parameters of an untrained MetadataModel(3, 100, 1)."""
    k1, k2, k3, k4 = jax.random.split(key, 4)
    w1 = _xavier_uniform(k1, IN_DIM, HIDDEN)       # Linear(3,100,bias=False), (in,out)
    w2 = _xavier_uniform(k2, HIDDEN, HIDDEN)       # Linear(100,100,bias=False)
    w3 = _xavier_uniform(k3, HIDDEN, 1)            # Linear(100,1) weight
    bnd = 1.0 / math.sqrt(HIDDEN)                  # default bias init
    b3 = jax.random.uniform(k4, (1, 1), jnp.float32, -bnd, bnd)
    bn = dict(gamma=jnp.ones((HIDDEN,), jnp.float32),
              beta=jnp.zeros((HIDDEN,), jnp.float32),
              mean=jnp.zeros((HIDDEN,), jnp.float32),
              var=jnp.ones((HIDDEN,), jnp.float32))
    return w1, dict(bn), w2, dict(bn), w3, b3


def prepare_kernel_params(w1, bn1, w2, bn2, w3, b3):
    """Fold eval-mode BatchNorm into the bias-free Linears, transpose to the
    (out, in) batch-along-lanes layout, zero-pad (in 3->8, hidden 100->128),
    and cast the matmul weights to bf16 (full-rate MXU; f32 accumulation in
    the kernel).  NOTE: re-run whenever trained running stats are loaded."""
    def fold(w, bn):
        scale = bn["gamma"] / jnp.sqrt(bn["var"] + EPS)
        shift = bn["beta"] - bn["mean"] * scale
        return w * scale[None, :], shift
    w1f, sh1 = fold(w1, bn1)
    w2f, sh2 = fold(w2, bn2)
    p = HPAD - HIDDEN
    w1t = jnp.pad(jnp.transpose(w1f), ((0, p), (0, IN_PAD - IN_DIM)))   # (HPAD, 8)
    b1 = jnp.pad(sh1, (0, p)).reshape(HPAD, 1)
    w2t = jnp.pad(jnp.transpose(w2f), ((0, p), (0, p)))                 # (HPAD, HPAD)
    b2 = jnp.pad(sh2, (0, p)).reshape(HPAD, 1)
    w3c = jnp.pad(w3, ((0, p), (0, 0)))                                 # (HPAD, 1)
    return (w1t.astype(jnp.bfloat16), b1,
            w2t.astype(jnp.bfloat16), b2, w3c, b3)


if __name__ == "__main__":
    key = jax.random.PRNGKey(0)
    kx, kp = jax.random.split(key)
    B = 8
    x = jax.random.normal(kx, (B, IN_DIM), jnp.float32)

    raw = init_raw_params(kp)
    params = prepare_kernel_params(*raw)

    out = selector_network_forward(x, params)
    out = jax.block_until_ready(out)

    # pure-JAX f32 reference (eval mode: Dropout = identity, BN via running stats)
    w1, bn1, w2, bn2, w3, b3 = raw
    s1 = bn1["gamma"] / jnp.sqrt(bn1["var"] + EPS)
    t1 = bn1["beta"] - bn1["mean"] * s1
    s2 = bn2["gamma"] / jnp.sqrt(bn2["var"] + EPS)
    t2 = bn2["beta"] - bn2["mean"] * s2
    h = jnp.maximum((x @ w1) * s1 + t1, 0.0)
    h = jnp.maximum((h @ w2) * s2 + t2, 0.0)
    ref = jax.nn.sigmoid(h @ w3 + b3)

    assert out.shape == (B, 1), out.shape
    # bf16 MXU operands (f32 accumulate) -> compare against the f32 reference
    # with a correspondingly relaxed tolerance.
    assert jnp.allclose(out, ref, atol=5e-3), (out, ref)
    print("KERNEL_OK")
</pallas_src>

<mosaic_0001>
module attributes {stable_mosaic.version = 11 : i64} {
  func.func @_mlp_kernel(%arg0: i32, %arg1: memref<8x128xf32, #tpu.memory_space<vmem>>, %arg2: memref<128x8xbf16, #tpu.memory_space<vmem>>, %arg3: memref<128x1xf32, #tpu.memory_space<vmem>>, %arg4: memref<128x128xbf16, #tpu.memory_space<vmem>>, %arg5: memref<128x1xf32, #tpu.memory_space<vmem>>, %arg6: memref<128x1xf32, #tpu.memory_space<vmem>>, %arg7: memref<1x1xf32, #tpu.memory_space<smem>>, %arg8: memref<1x128xf32, #tpu.memory_space<vmem>>) attributes {dimension_semantics = [#tpu.dimension_semantics<parallel>], iteration_bounds = array<i64: 1>, scalar_prefetch = 0 : i64, scratch_operands = 0 : i64, tpu.core_type = #tpu.core_type<tc>, window_params = [{transform_indices = @transform_0, window_bounds = array<i64: 8, 128>}, {pipeline_mode = #tpu.pipeline_mode<synchronous>, transform_indices = @transform_1, window_bounds = array<i64: 128, 8>}, {pipeline_mode = #tpu.pipeline_mode<synchronous>, transform_indices = @transform_2, window_bounds = array<i64: 128, 1>}, {pipeline_mode = #tpu.pipeline_mode<synchronous>, transform_indices = @transform_3, window_bounds = array<i64: 128, 128>}, {pipeline_mode = #tpu.pipeline_mode<synchronous>, transform_indices = @transform_4, window_bounds = array<i64: 128, 1>}, {pipeline_mode = #tpu.pipeline_mode<synchronous>, transform_indices = @transform_5, window_bounds = array<i64: 128, 1>}, {transform_indices = @transform_6, window_bounds = array<i64: 1, 1>}, {transform_indices = @transform_7, window_bounds = array<i64: 1, 128>}]} {
    %c0 = arith.constant 0 : index
    %c0_0 = arith.constant 0 : index
    %0 = vector.load %arg1[%c0, %c0_0] : memref<8x128xf32, #tpu.memory_space<vmem>>, vector<8x128xf32>
    %1 = arith.truncf %0 : vector<8x128xf32> to vector<8x128xbf16>
    %c0_1 = arith.constant 0 : index
    %c0_2 = arith.constant 0 : index
    %2 = vector.load %arg2[%c0_1, %c0_2] : memref<128x8xbf16, #tpu.memory_space<vmem>>, vector<128x8xbf16>
    %cst = arith.constant dense<0.000000e+00> : vector<128x128xf32>
    %3 = tpu.matmul %2, %1, %cst {dimension_numbers = #tpu.dot_dimension_numbers<[1], [0], [0], [1], [0, 0, 1, 1], [], []>} : vector<128x8xbf16>, vector<8x128xbf16>, vector<128x128xf32> -> vector<128x128xf32>
    %c0_3 = arith.constant 0 : index
    %c0_4 = arith.constant 0 : index
    %4 = vector.load %arg3[%c0_3, %c0_4] : memref<128x1xf32, #tpu.memory_space<vmem>>, vector<128x1xf32>
    %5 = vector.broadcast %4 : vector<128x1xf32> to vector<128x128xf32>
    %6 = arith.addf %3, %5 : vector<128x128xf32>
    %cst_5 = arith.constant 0.000000e+00 : f32
    %7 = vector.broadcast %cst_5 : f32 to vector<128x128xf32>
    %8 = arith.maximumf %6, %7 : vector<128x128xf32>
    %c0_6 = arith.constant 0 : index
    %c0_7 = arith.constant 0 : index
    %9 = vector.load %arg4[%c0_6, %c0_7] : memref<128x128xbf16, #tpu.memory_space<vmem>>, vector<128x128xbf16>
    %10 = arith.truncf %8 : vector<128x128xf32> to vector<128x128xbf16>
    %cst_8 = arith.constant dense<0.000000e+00> : vector<128x128xf32>
    %11 = tpu.matmul %9, %10, %cst_8 {dimension_numbers = #tpu.dot_dimension_numbers<[1], [0], [0], [1], [0, 0, 1, 1], [], []>} : vector<128x128xbf16>, vector<128x128xbf16>, vector<128x128xf32> -> vector<128x128xf32>
    %c0_9 = arith.constant 0 : index
    %c0_10 = arith.constant 0 : index
    %12 = vector.load %arg5[%c0_9, %c0_10] : memref<128x1xf32, #tpu.memory_space<vmem>>, vector<128x1xf32>
    %13 = vector.broadcast %12 : vector<128x1xf32> to vector<128x128xf32>
    %14 = arith.addf %11, %13 : vector<128x128xf32>
    %cst_11 = arith.constant 0.000000e+00 : f32
    %15 = vector.broadcast %cst_11 : f32 to vector<128x128xf32>
    %16 = arith.maximumf %14, %15 : vector<128x128xf32>
    %c0_12 = arith.constant 0 : index
    %c0_13 = arith.constant 0 : index
    %17 = vector.load %arg6[%c0_12, %c0_13] : memref<128x1xf32, #tpu.memory_space<vmem>>, vector<128x1xf32>
    %18 = vector.broadcast %17 : vector<128x1xf32> to vector<128x128xf32>
    %19 = arith.mulf %16, %18 : vector<128x128xf32>
    %cst_14 = arith.constant dense<0.000000e+00> : vector<128xf32>
    %20 = vector.multi_reduction <add>, %19, %cst_14 [0] : vector<128x128xf32> to vector<128xf32>
    %21 = vector.shape_cast %20 : vector<128xf32> to vector<1x128xf32>
    %c0_15 = arith.constant 0 : index
    %c0_16 = arith.constant 0 : index
    %22 = memref.load %arg7[%c0_15, %c0_16] : memref<1x1xf32, #tpu.memory_space<smem>>
    %23 = vector.broadcast %22 : f32 to vector<1x128xf32>
    %24 = arith.addf %21, %23 : vector<1x128xf32>
    %25 = arith.negf %24 : vector<1x128xf32>
    %26 = math.exp %25 : vector<1x128xf32>
    %cst_17 = arith.constant 1.000000e+00 : f32
    %27 = vector.broadcast %cst_17 : f32 to vector<1x128xf32>
    %28 = arith.addf %27, %26 : vector<1x128xf32>
    %29 = arith.divf %27, %28 : vector<1x128xf32>
    %c0_18 = arith.constant 0 : index
    %c0_19 = arith.constant 0 : index
    %30 = vector.load %arg8[%c0_18, %c0_19] : memref<1x128xf32, #tpu.memory_space<vmem>>, vector<1x128xf32>
    tpu.vector_store %arg8[%c0_18, %c0_19], %29 {strides = array<i32>} : memref<1x128xf32, #tpu.memory_space<vmem>>, vector<1x128xf32>,
    return
  }
  func.func @transform_0(%arg0: i32) -> (i32, i32) {
    %c0_i32 = arith.constant 0 : i32
    %c0_i32_0 = arith.constant 0 : i32
    return %c0_i32, %arg0 : i32, i32
  }
  func.func @transform_1(%arg0: i32) -> (i32, i32) {
    %c0_i32 = arith.constant 0 : i32
    %c0_i32_0 = arith.constant 0 : i32
    %c0_i32_1 = arith.constant 0 : i32
    return %c0_i32, %c0_i32_0 : i32, i32
  }
  func.func @transform_2(%arg0: i32) -> (i32, i32) {
    %c0_i32 = arith.constant 0 : i32
    %c0_i32_0 = arith.constant 0 : i32
    %c0_i32_1 = arith.constant 0 : i32
    return %c0_i32, %c0_i32_0 : i32, i32
  }
  func.func @transform_3(%arg0: i32) -> (i32, i32) {
    %c0_i32 = arith.constant 0 : i32
    %c0_i32_0 = arith.constant 0 : i32
    %c0_i32_1 = arith.constant 0 : i32
    return %c0_i32, %c0_i32_0 : i32, i32
  }
  func.func @transform_4(%arg0: i32) -> (i32, i32) {
    %c0_i32 = arith.constant 0 : i32
    %c0_i32_0 = arith.constant 0 : i32
    %c0_i32_1 = arith.constant 0 : i32
    return %c0_i32, %c0_i32_0 : i32, i32
  }
  func.func @transform_5(%arg0: i32) -> (i32, i32) {
    %c0_i32 = arith.constant 0 : i32
    %c0_i32_0 = arith.constant 0 : i32
    %c0_i32_1 = arith.constant 0 : i32
    return %c0_i32, %c0_i32_0 : i32, i32
  }
  func.func @transform_6(%arg0: i32) -> (i32, i32) {
    %c0_i32 = arith.constant 0 : i32
    %c0_i32_0 = arith.constant 0 : i32
    %c0_i32_1 = arith.constant 0 : i32
    return %c0_i32, %c0_i32_0 : i32, i32
  }
  func.func @transform_7(%arg0: i32) -> (i32, i32) {
    %c0_i32 = arith.constant 0 : i32
    %c0_i32_0 = arith.constant 0 : i32
    return %c0_i32, %arg0 : i32, i32
  }
}

</mosaic_0001>

<bundles_post_ra>
// kernel: tpu_custom_call.1
= control target key start
LH: loop header
LB: loop body
LE: loop exit
PB: predicated region body
PF: predicated region fallthrough
CT: control target
= control target key end

     0   :  { %v815_v3 = vmov 0   ;;  %vm208_vm0 = vcmask 1043456   ;;  %vm183_vm1 = vcmask 64512   ;;  %s1073_s0 = inlined_call_operand.vmem [shape: f32[8,8], index: 0, kind: input, shape index: {}]   ;;  %s1074_s1 = inlined_call_operand.vmem [shape: bf16[128,8], index: 1, kind: input, shape index: {}]   ;;  %s1075_s2 = inlined_call_operand.vmem [shape: f32[128,1], index: 2, kind: input, shape index: {}]   ;;  %s1076_s3 = inlined_call_operand.vmem [shape: bf16[128,128], index: 3, kind: input, shape index: {}]   ;;  %s1077_s4 = inlined_call_operand.vmem [shape: f32[128,1], index: 4, kind: input, shape index: {}]   ;;  %s1078_s5 = inlined_call_operand.vmem [shape: f32[128,1], index: 5, kind: input, shape index: {}]   ;;  %s1079_s6 = inlined_call_operand.<no memory space> [shape: f32[1,1], index: 6, kind: input, shape index: {}]   ;;  %s1080_s7 = inlined_call_operand.hbm [shape: f32[1,128], index: 7, kind: output, shape index: {}]  }
   0x1   :  { %v61_v0 = vld [vmem:[%s1075_s2 + $0x70] sm:$0xff]  ;;  %v59_v1 = vld [vmem:[%s1075_s2 + $0x60] sm:$0xff]  ;;  %784 = vset.pattern.permute.xlu2 %v815_v3  ;;  %783 = vset.pattern.permute.xlu1 %v815_v3  ;;  %v760_v8 = vld [vmem:[%s1074_s1 + $0x28] sm:$0xff] }
   0x2   :  { %v57_v2 = vld [vmem:[%s1075_s2 + $0x50] sm:$0xff]  ;;  %v29_v4 = vld [vmem:[%s1073_s0] sm:$0xff]  ;;  %782 = vset.pattern.permute.xlu0 %v815_v3  ;;  %125 = vperm.xlu1 %783, %v59_v1   ;;  %v60_v9 = vld [vmem:[%s1075_s2 + $0x68] sm:$0xff] }
   0x3   :  { %v30_v5 = vpack.c.bf16 %v29_v4, %v29_v4  ;;  %135 = vperm.xlu0 %782, %v61_v0   ;;  %115 = vperm.xlu2 %784, %v57_v2   ;;  %v755_v7 = vld [vmem:[%s1074_s1] sm:$0xff] }
   0x5   :  { %v210_v6 = vsel %vm208_vm0, %v30_v5, 0 }
   0x6   :  { %219 = vmatpush.bf16.msra.mxu0 %v210_v6  ;;  %771 = vmatpush.bf16.msra.mxu3 %v210_v6 }
   0x7   :  { %13 = vsyncpa [#allocation4], 0  ;;  %v62_v10 = vld [vmem:[%s1075_s2 + $0x78] sm:$0xff]  ;;  %v56_v12 = vld [vmem:[%s1075_s2 + $0x48] sm:$0xff]  ;;  %s816_s28 = smov [#allocation3]  }
   0x8   :  { %v58_v11 = vld [vmem:[%s1075_s2 + $0x58] sm:$0xff]  ;;  %v55_v13 = vld [vmem:[%s1075_s2 + $0x40] sm:$0xff]  ;;  %v53_v14 = vld [vmem:[%s1075_s2 + $0x30] sm:$0xff]  ;;  %s671_s29 = sshll.u32 %s816_s28, 4  ;;  %s672_s29 = int_to_ptr.vmem [resolvable:$true] %s671_s29 }
   0x9   :  { %714 = vmatmul.msk.bf16.vlgmr.msra.gmra.mxu0 %vm183_vm1, %v755_v7  ;;  %719 = vmatmul.msk.bf16.vlgmr.msra.gmra.mxu3 %vm183_vm1, %v760_v8  ;;  %v756_v15 = vld [vmem:[%s1074_s1 + $0x8] sm:$0xff]  ;;  %v761_v16 = vld [vmem:[%s1074_s1 + $0x30] sm:$0xff]  ;;  %v51_v17 = vld [vmem:[%s1075_s2 + $0x20] sm:$0xff] }
   0xa   :  { %130 = vperm.xlu1 %783, %v60_v9   ;;  %v54_v18 = vld [vmem:[%s1075_s2 + $0x38] sm:$0xff]  ;;  %v52_v19 = vld [vmem:[%s1075_s2 + $0x28] sm:$0xff]  ;;  %v49_v21 = vld [vmem:[%s1075_s2 + $0x10] sm:$0xff] }
   0xb   :  { %140 = vperm.xlu0 %782, %v62_v10   ;;  %120 = vperm.xlu2 %784, %v58_v11   ;;  %v50_v20 = vld [vmem:[%s1075_s2 + $0x18] sm:$0xff]  ;;  %v47_v22 = vld [vmem:[%s1075_s2] sm:$0xff]  ;;  %v757_v23 = vld [vmem:[%s1074_s1 + $0x10] sm:$0xff] }
   0xc   :  { %v762_v24 = vld [vmem:[%s1074_s1 + $0x38] sm:$0xff]  ;;  %v301_v25 = vld [vmem:[%s1077_s4] sm:$0xff]  ;;  %v48_v26 = vld [vmem:[%s1075_s2 + $0x8] sm:$0xff] }
   0xd   :  { %v302_v27 = vld [vmem:[%s1077_s4 + $0x8] sm:$0xff]  ;;  %v304_v28 = vld [vmem:[%s1077_s4 + $0x18] sm:$0xff]  ;;  %v303_v29 = vld [vmem:[%s1077_s4 + $0x10] sm:$0xff] }
   0xe   :  { %v305_v30 = vld [vmem:[%s1077_s4 + $0x20] sm:$0xff]  ;;  %v758_v31 = vld [vmem:[%s1074_s1 + $0x18] sm:$0xff]  ;;  %v307_v32 = vld [vmem:[%s1077_s4 + $0x30] sm:$0xff] }
   0xf   :  { %v306_v33 = vld [vmem:[%s1077_s4 + $0x28] sm:$0xff]  ;;  %v308_v34 = vld [vmem:[%s1077_s4 + $0x38] sm:$0xff]  ;;  %v309_v36 = vld [vmem:[%s1077_s4 + $0x40] sm:$0xff] }
  0x10   :  { %v310_v35 = vld [vmem:[%s1077_s4 + $0x48] sm:$0xff]  ;;  %v311_v37 = vld [vmem:[%s1077_s4 + $0x50] sm:$0xff]  ;;  %v759_v38 = vld [vmem:[%s1074_s1 + $0x20] sm:$0xff] }
  0x11   :  { %v313_v39 = vld [vmem:[%s1077_s4 + $0x60] sm:$0xff]  ;;  %v312_v40 = vld [vmem:[%s1077_s4 + $0x58] sm:$0xff]  ;;  %v512_v42 = vld [vmem:[%s1078_s5 + $0x10] sm:$0xff] }
  0x12   :  { %110 = vperm.xlu1 %783, %v56_v12   ;;  %v510_v41 = vld [vmem:[%s1078_s5] sm:$0xff]  ;;  %v511_v43 = vld [vmem:[%s1078_s5 + $0x8] sm:$0xff]  ;;  %v513_v44 = vld [vmem:[%s1078_s5 + $0x18] sm:$0xff] }
  0x13   :  { %105 = vperm.xlu0 %782, %v55_v13   ;;  %95 = vperm.xlu2 %784, %v53_v14   ;;  %v515_v45 = vld [vmem:[%s1078_s5 + $0x28] sm:$0xff]  ;;  %v514_v46 = vld [vmem:[%s1078_s5 + $0x20] sm:$0xff]  ;;  %v516_v47 = vld [vmem:[%s1078_s5 + $0x30] sm:$0xff] }
  0x14   :  { %v518_v48 = vld [vmem:[%s1078_s5 + $0x40] sm:$0xff]  ;;  %v517_v49 = vld [vmem:[%s1078_s5 + $0x38] sm:$0xff]  ;;  %v519_v50 = vld [vmem:[%s1078_s5 + $0x48] sm:$0xff] }
  0x15   :  { %v314_v51 = vld [vmem:[%s1077_s4 + $0x68] sm:$0xff]  ;;  %v520_v52 = vld [vmem:[%s1078_s5 + $0x50] sm:$0xff]  ;;  %v521_v53 = vld [vmem:[%s1078_s5 + $0x58] sm:$0xff] }
  0x16   :  { %v522_v54 = vld [vmem:[%s1078_s5 + $0x60] sm:$0xff]  ;;  %v315_v55 = vld [vmem:[%s1077_s4 + $0x70] sm:$0xff]  ;;  %v316_v56 = vld [vmem:[%s1077_s4 + $0x78] sm:$0xff] }
  0x17   :  { %v524_v59 = vld [vmem:[%s1078_s5 + $0x70] sm:$0xff]  ;;  %v523_v60 = vld [vmem:[%s1078_s5 + $0x68] sm:$0xff]  ;;  %v525_v61 = vld [vmem:[%s1078_s5 + $0x78] sm:$0xff] }
  0x19   :  { %715 = vmatmul.msk.bf16.gmra.mxu0 %vm183_vm1, %v756_v15  ;;  %720 = vmatmul.msk.bf16.gmra.mxu3 %vm183_vm1, %v761_v16 }
  0x1a   :  { %85 = vperm.xlu1 %783, %v51_v17  }
  0x1b   :  { %100 = vperm.xlu0 %782, %v54_v18   ;;  %90 = vperm.xlu2 %784, %v52_v19  }
  0x22   :  { %80 = vperm.xlu1 %783, %v50_v20  }
  0x23   :  { %75 = vperm.xlu0 %782, %v49_v21   ;;  %65 = vperm.xlu2 %784, %v47_v22  }
  0x29   :  { %716 = vmatmul.msk.bf16.gmra.mxu0 %vm183_vm1, %v757_v23  ;;  %721 = vmatmul.msk.bf16.gmra.mxu3 %vm183_vm1, %v762_v24 }
  0x2a   :  { %319 = vperm.xlu1 %783, %v301_v25  }
  0x2b   :  { %70 = vperm.xlu0 %782, %v48_v26   ;;  %324 = vperm.xlu2 %784, %v302_v27  }
  0x32   :  { %334 = vperm.xlu1 %783, %v304_v28  }
  0x33   :  { %329 = vperm.xlu0 %782, %v303_v29   ;;  %339 = vperm.xlu2 %784, %v305_v30  }
  0x39   :  { %717 = vmatmul.msk.bf16.gmra.mxu0 %vm183_vm1, %v758_v31 }
  0x3a   :  { %349 = vperm.xlu1 %783, %v307_v32  }
  0x3b   :  { %344 = vperm.xlu0 %782, %v306_v33   ;;  %354 = vperm.xlu2 %784, %v308_v34  }
  0x42   :  { %364 = vperm.xlu1 %783, %v310_v35  }
  0x43   :  { %359 = vperm.xlu0 %782, %v309_v36   ;;  %369 = vperm.xlu2 %784, %v311_v37  }
  0x49   :  { %718 = vmatmul.msk.bf16.gmra.mxu0 %vm183_vm1, %v759_v38 }
  0x4a   :  { %379 = vperm.xlu1 %783, %v313_v39  }
  0x4b   :  { %374 = vperm.xlu0 %782, %v312_v40   ;;  %528 = vperm.xlu2 %784, %v510_v41  }
  0x52   :  { %538 = vperm.xlu1 %783, %v512_v42  }
  0x53   :  { %533 = vperm.xlu0 %782, %v511_v43   ;;  %543 = vperm.xlu2 %784, %v513_v44  }
  0x5a   :  { %553 = vperm.xlu1 %783, %v515_v45  }
  0x5b   :  { %548 = vperm.xlu0 %782, %v514_v46   ;;  %558 = vperm.xlu2 %784, %v516_v47  }
  0x5d   :  { %v116_v57 = vpop.permute.xlu2 %115 }
  0x62   :  { %568 = vperm.xlu1 %783, %v518_v48  }
  0x63   :  { %563 = vperm.xlu0 %782, %v517_v49   ;;  %573 = vperm.xlu2 %784, %v519_v50  }
  0x65   :  { %v121_v62 = vpop.permute.xlu2 %120 }
  0x6a   :  { %384 = vperm.xlu1 %783, %v314_v51  }
  0x6b   :  { %578 = vperm.xlu0 %782, %v520_v52   ;;  %583 = vperm.xlu2 %784, %v521_v53  }
  0x6d   :  { %v96_v2 = vpop.permute.xlu2 %95 }
  0x72   :  { %588 = vperm.xlu1 %783, %v522_v54  }
  0x73   :  { %389 = vperm.xlu0 %782, %v315_v55   ;;  %394 = vperm.xlu2 %784, %v316_v56  }
  0x74   :  { %v126_v21 = vpop.permute.xlu1 %125 }
  0x75   :  { %v136_v58 = vpop.permute.xlu0 %135  ;;  %v91_v6 = vpop.permute.xlu2 %90 }
  0x7a   :  { %598 = vperm.xlu1 %783, %v524_v59  }
  0x7b   :  { %593 = vperm.xlu0 %782, %v523_v60   ;;  %603 = vperm.xlu2 %784, %v525_v61  }
  0x7c   :  { %v131_v25 = vpop.permute.xlu1 %130 }
  0x7d   :  { %v141_v63 = vpop.permute.xlu0 %140  ;;  %v66_v10 = vpop.permute.xlu2 %65 }
  0x84   :  { %v111_v43 = vpop.permute.xlu1 %110 }
  0x85   :  { %v106_v0 = vpop.permute.xlu0 %105 }
  0x86   :  { %v221_v1 = vpop.f32.mrf.mxu0 }
  0x87   :  { %v222_v12 = vadd.f32 %v221_v1, %v66_v10  ;;  %v766_v10 = vld [vmem:[%s1076_s3 + $0x18] sm:$0xff] }
  0x89   :  { %v261_v16 = vmax.f32 %v222_v12, 0.0 }
  0x8c   :  { %v246_v3 = vpop.f32.mrf.mxu3  ;;  %v86_v45 = vpop.permute.xlu1 %85 }
  0x8d   :  { %v101_v4 = vpop.permute.xlu0 %100  ;;  %v247_v33 = vadd.f32 %v246_v3, %v116_v57 }
  0x8e   :  { %v223_v5 = vpop.f32.mrf.mxu0 }
  0x8f   :  { %v271_v38 = vmax.f32 %v247_v33, 0.0 }
  0x94   :  { %v248_v7 = vpop.f32.mrf.mxu3 }
  0x95   :  { %v76_v8 = vpop.permute.xlu0 %75  ;;  %v249_v34 = vadd.f32 %v248_v7, %v121_v62  ;;  %v768_v7 = vld [vmem:[%s1076_s3 + $0x28] sm:$0xff] }
  0x96   :  { %v226_v9 = vpop.f32.mrf.mxu0 }
  0x97   :  { %v272_v39 = vmax.f32 %v249_v34, 0.0  ;;  %v227_v62 = vadd.f32 %v226_v9, %v76_v8  ;;  %v765_v8 = vld [vmem:[%s1076_s3 + $0x10] sm:$0xff] }
  0x98   :  { %v769_v9 = vld [vmem:[%s1076_s3 + $0x30] sm:$0xff] }
  0x99   :  { %v298_v42 = vpack.c.bf16 %v272_v39, %v271_v38 }
  0x9c   :  { %v251_v11 = vpop.f32.mrf.mxu3 }
  0x9d   :  { %v71_v13 = vpop.permute.xlu0 %70  ;;  %v252_v27 = vadd.f32 %v251_v11, %v126_v21  ;;  %v770_v11 = vld [vmem:[%s1076_s3 + $0x38] sm:$0xff] }
  0x9e   :  { %v224_v14 = vadd.f32 %v223_v5, %v71_v13  ;;  %v228_v15 = vpop.f32.mrf.mxu0  ;;  %v767_v5 = vld [vmem:[%s1076_s3 + $0x20] sm:$0xff]  ;;  %v325_v13 = vpop.permute.xlu2 %324 }
  0x9f   :  { %v273_v35 = vmax.f32 %v252_v27, 0.0 }
  0xa0   :  { %v262_v17 = vmax.f32 %v224_v14, 0.0 }
  0xa2   :  { %v1036_v18 = vpack.c.bf16 %v262_v17, %v261_v16 }
  0xa4   :  { %v253_v19 = vpop.f32.mrf.mxu3 }
  0xa5   :  { %v254_v28 = vadd.f32 %v253_v19, %v131_v25  ;;  %v330_v14 = vpop.permute.xlu0 %329 }
  0xa6   :  { %v231_v20 = vpop.f32.mrf.mxu0  ;;  %v340_v16 = vpop.permute.xlu2 %339 }
  0xa7   :  { %v274_v36 = vmax.f32 %v254_v28, 0.0  ;;  %v232_v56 = vadd.f32 %v231_v20, %v86_v45 }
  0xa9   :  { %v299_v40 = vpack.c.bf16 %v274_v36, %v273_v35 }
  0xac   :  { %v256_v22 = vpop.f32.mrf.mxu3 }
  0xad   :  { %v257_v24 = vadd.f32 %v256_v22, %v136_v58  ;;  %v81_v58 = vpop.permute.xlu1 %80  ;;  %v345_v17 = vpop.permute.xlu0 %344 }
  0xae   :  { %v233_v23 = vpop.f32.mrf.mxu0  ;;  %v229_v59 = vadd.f32 %v228_v15, %v81_v58  ;;  %v355_v19 = vpop.permute.xlu2 %354 }
  0xaf   :  { %v275_v29 = vmax.f32 %v257_v24, 0.0  ;;  %v234_v53 = vadd.f32 %v233_v23, %v91_v6  ;;  %v764_v6 = vld [vmem:[%s1076_s3 + $0x8] sm:$0xff] }
  0xb1   :  { %v266_v60 = vmax.f32 %v234_v53, 0.0 }
  0xb4   :  { %v258_v26 = vpop.f32.mrf.mxu3 }
  0xb5   :  { %v259_v30 = vadd.f32 %v258_v26, %v141_v63  ;;  %v265_v63 = vmax.f32 %v232_v56, 0.0  ;;  %v320_v12 = vpop.permute.xlu1 %319  ;;  %v360_v21 = vpop.permute.xlu0 %359 }
  0xb6   :  { %v236_v32 = vpop.f32.mrf.mxu0  ;;  %v370_v23 = vpop.permute.xlu2 %369 }
  0xb7   :  { %v276_v31 = vmax.f32 %v259_v30, 0.0  ;;  %v237_v50 = vadd.f32 %v236_v32, %v96_v2  ;;  %v295_v1 = vpack.c.bf16 %v266_v60, %v265_v63  ;;  %v263_v2 = vmax.f32 %v227_v62, 0.0 }
  0xb9   :  { %v300_v37 = vpack.c.bf16 %v276_v31, %v275_v29  ;;  %v267_v57 = vmax.f32 %v237_v50, 0.0 }
  0xbb   :  { %445 = vmatpush.bf16.msra.mxu1 %v300_v37  ;;  %772 = vmatpush.bf16.msra.mxu2 %v300_v37 }
  0xbd   :  { %v335_v15 = vpop.permute.xlu1 %334  ;;  %v375_v26 = vpop.permute.xlu0 %374 }
  0xbe   :  { %v238_v41 = vpop.f32.mrf.mxu0  ;;  %v529_v29 = vpop.permute.xlu2 %528 }
  0xbf   :  { %446 = vmatpush.bf16.msra.mxu1 %v299_v40  ;;  %773 = vmatpush.bf16.msra.mxu2 %v299_v40  ;;  %v239_v48 = vadd.f32 %v238_v41, %v101_v4  ;;  %v763_v4 = vld [vmem:[%s1076_s3] sm:$0xff] }
  0xc1   :  { %v268_v54 = vmax.f32 %v239_v48, 0.0 }
  0xc3   :  { %447 = vmatpush.bf16.msra.mxu1 %v298_v42  ;;  %774 = vmatpush.bf16.msra.mxu2 %v298_v42  ;;  %v296_v61 = vpack.c.bf16 %v268_v54, %v267_v57 }
  0xc5   :  { %v534_v31 = vpop.permute.xlu0 %533 }
  0xc6   :  { %v241_v44 = vpop.f32.mrf.mxu0  ;;  %v544_v35 = vpop.permute.xlu2 %543 }
  0xc7   :  { %v242_v46 = vadd.f32 %v241_v44, %v106_v0  ;;  %v264_v0 = vmax.f32 %v229_v59, 0.0 }
  0xc9   :  { %v269_v51 = vmax.f32 %v242_v46, 0.0  ;;  %v294_v3 = vpack.c.bf16 %v264_v0, %v263_v2 }
  0xcd   :  { %v549_v37 = vpop.permute.xlu0 %548 }
  0xce   :  { %v243_v47 = vpop.f32.mrf.mxu0  ;;  %v559_v40 = vpop.permute.xlu2 %558 }
  0xcf   :  { %v244_v49 = vadd.f32 %v243_v47, %v111_v43 }
  0xd1   :  { %v270_v52 = vmax.f32 %v244_v49, 0.0 }
  0xd3   :  { %v297_v55 = vpack.c.bf16 %v270_v52, %v269_v51 }
  0xd5   :  { %448 = vmatpush.bf16.msra.mxu1 %v297_v55  ;;  %775 = vmatpush.bf16.msra.mxu2 %v297_v55  ;;  %v564_v46 = vpop.permute.xlu0 %563 }
  0xd6   :  { %v574_v50 = vpop.permute.xlu2 %573 }
  0xd9   :  { %449 = vmatpush.bf16.msra.mxu1 %v296_v61  ;;  %776 = vmatpush.bf16.msra.mxu2 %v296_v61 }
  0xdd   :  { %450 = vmatpush.bf16.msra.mxu1 %v295_v1  ;;  %777 = vmatpush.bf16.msra.mxu2 %v295_v1  ;;  %v579_v2 = vpop.permute.xlu0 %578 }
  0xe1   :  { %451 = vmatpush.bf16.msra.mxu1 %v294_v3  ;;  %778 = vmatpush.bf16.msra.mxu2 %v294_v3 }
  0xe5   :  { %452 = vmatpush.bf16.msra.mxu1 %v1036_v18  ;;  %779 = vmatpush.bf16.msra.mxu2 %v1036_v18  ;;  %v350_v18 = vpop.permute.xlu1 %349 }
  0xe8   :  { %453 = vmatmul.bf16.vlgmr.msra.gmra.mxu1 %v763_v4  ;;  %473 = vmatmul.bf16.vlgmr.msra.gmra.mxu2 %v767_v5 }
  0xed   :  { %v365_v22 = vpop.permute.xlu1 %364 }
  0xf5   :  { %v1064_v27 = vpop.permute.xlu1 %379 }
  0xf8   :  { %458 = vmatmul.bf16.gmra.mxu1 %v764_v6  ;;  %478 = vmatmul.bf16.gmra.mxu2 %v768_v7  ;;  %v584_v7 = vpop.permute.xlu2 %583 }
  0xfd   :  { %v539_v33 = vpop.permute.xlu1 %538 }
 0x105   :  { %v554_v39 = vpop.permute.xlu1 %553 }
 0x108   :  { %463 = vmatmul.bf16.gmra.mxu1 %v765_v8  ;;  %483 = vmatmul.bf16.gmra.mxu2 %v769_v9 }
 0x10d   :  { %v569_v49 = vpop.permute.xlu1 %568 }
 0x115   :  { %v385_v6 = vpop.permute.xlu1 %384 }
 0x118   :  { %468 = vmatmul.bf16.gmra.mxu1 %v766_v10  ;;  %488 = vmatmul.bf16.gmra.mxu2 %v770_v11 }
 0x165   :  { %v454_v20 = vpop.f32.mrf.mxu1 }
 0x166   :  { %v455_v44 = vadd.f32 %v454_v20, %v320_v12 }
 0x168   :  { %v494_v51 = vmax.f32 %v455_v44, 0.0 }
 0x16a   :  { %v606_v59 = vmul.f32 %v529_v29, %v494_v51 }
 0x16b   :  { %v474_v24 = vpop.f32.mrf.mxu2 }
 0x16c   :  { %v475_v8 = vadd.f32 %v474_v24, %v360_v21 }
 0x16d   :  { %v456_v25 = vpop.f32.mrf.mxu1 }
 0x16e   :  { %v457_v42 = vadd.f32 %v456_v25, %v325_v13 }
 0x170   :  { %v495_v47 = vmax.f32 %v457_v42, 0.0 }
 0x172   :  { %v607_v55 = vmul.f32 %v534_v31, %v495_v47 }
 0x173   :  { %v476_v28 = vpop.f32.mrf.mxu2 }
 0x174   :  { %v622_v63 = vadd.f32 %v607_v55, %v606_v59  ;;  %v477_v13 = vadd.f32 %v476_v28, %v365_v22 }
 0x175   :  { %v459_v30 = vpop.f32.mrf.mxu1 }
 0x176   :  { %v460_v45 = vadd.f32 %v459_v30, %v330_v14  ;;  %v503_v29 = vmax.f32 %v477_v13, 0.0 }
 0x178   :  { %v496_v52 = vmax.f32 %v460_v45, 0.0 }
 0x17a   :  { %v608_v60 = vmul.f32 %v539_v33, %v496_v52 }
 0x17b   :  { %v479_v32 = vpop.f32.mrf.mxu2 }
 0x17c   :  { %v623_v3 = vadd.f32 %v622_v63, %v608_v60 }
 0x17d   :  { %v461_v34 = vpop.f32.mrf.mxu1 }
 0x17e   :  { %v462_v48 = vadd.f32 %v461_v34, %v335_v15  ;;  %v390_v34 = vpop.permute.xlu0 %389 }
 0x180   :  { %v497_v56 = vmax.f32 %v462_v48, 0.0 }
 0x182   :  { %v609_v0 = vmul.f32 %v544_v35, %v497_v56 }
 0x183   :  { %v481_v36 = vpop.f32.mrf.mxu2 }
 0x184   :  { %v624_v9 = vadd.f32 %v623_v3, %v609_v0  ;;  %v482_v30 = vadd.f32 %v481_v36, %v375_v26  ;;  %v644_v0 = vstv %s1079_s6  ;;  %s673_s6 = sshll.u32 %s1080_s7, 4  ;;  %s674_s6 = int_to_ptr.hbm [resolvable:$true] %s673_s6 }
 0x185   :  { %v464_v38 = vpop.f32.mrf.mxu1 }
 0x186   :  { %v465_v53 = vadd.f32 %v464_v38, %v340_v16  ;;  %v589_v38 = vpop.permute.xlu1 %588  ;;  %v505_v22 = vmax.f32 %v482_v30, 0.0 }
 0x188   :  { %v498_v61 = vmax.f32 %v465_v53, 0.0  ;;  %v617_v26 = vmul.f32 %v584_v7, %v505_v22 }
 0x18a   :  { %v610_v4 = vmul.f32 %v549_v37, %v498_v61 }
 0x18b   :  { %v484_v41 = vpop.f32.mrf.mxu2 }
 0x18c   :  { %v625_v14 = vadd.f32 %v624_v9, %v610_v4  ;;  %v485_v21 = vadd.f32 %v484_v41, %v1064_v27  ;;  %v594_v27 = vpop.permute.xlu0 %593 }
 0x18d   :  { %v466_v43 = vpop.f32.mrf.mxu1 }
 0x18e   :  { %v467_v57 = vadd.f32 %v466_v43, %v345_v17  ;;  %v502_v17 = vmax.f32 %v475_v8, 0.0  ;;  %v599_v52 = vpop.permute.xlu1 %598 }
 0x190   :  { %v499_v1 = vmax.f32 %v467_v57, 0.0  ;;  %v614_v35 = vmul.f32 %v569_v49, %v502_v17 }
 0x192   :  { %v611_v10 = vmul.f32 %v554_v39, %v499_v1  ;;  %v615_v39 = vmul.f32 %v574_v50, %v503_v29 }
 0x193   :  { %v486_v54 = vpop.f32.mrf.mxu2 }
 0x194   :  { %v626_v20 = vadd.f32 %v625_v14, %v611_v10  ;;  %v487_v28 = vadd.f32 %v486_v54, %v385_v6 }
 0x195   :  { %v469_v58 = vpop.f32.mrf.mxu1 }
 0x196   :  { %v470_v62 = vadd.f32 %v469_v58, %v350_v18  ;;  %v480_v18 = vadd.f32 %v479_v32, %v370_v23  ;;  %v506_v32 = vmax.f32 %v485_v21, 0.0  ;;  %v507_v36 = vmax.f32 %v487_v28, 0.0 }
 0x198   :  { %v500_v5 = vmax.f32 %v470_v62, 0.0  ;;  %v504_v37 = vmax.f32 %v480_v18, 0.0  ;;  %v618_v47 = vmul.f32 %v589_v38, %v506_v32  ;;  %v619_v41 = vmul.f32 %v594_v27, %v507_v36 }
 0x19a   :  { %v612_v15 = vmul.f32 %v559_v40, %v500_v5  ;;  %v616_v23 = vmul.f32 %v579_v2, %v504_v37 }
 0x19b   :  { %v489_v11 = vpop.f32.mrf.mxu2 }
 0x19c   :  { %v627_v31 = vadd.f32 %v626_v20, %v612_v15  ;;  %v490_v43 = vadd.f32 %v489_v11, %v390_v34 }
 0x19d   :  { %v471_v12 = vpop.f32.mrf.mxu1 }
 0x19e   :  { %v472_v16 = vadd.f32 %v471_v12, %v355_v19  ;;  %v395_v19 = vpop.permute.xlu2 %394  ;;  %v508_v48 = vmax.f32 %v490_v43, 0.0 }
 0x1a0   :  { %v501_v25 = vmax.f32 %v472_v16, 0.0  ;;  %v620_v53 = vmul.f32 %v599_v52, %v508_v48 }
 0x1a2   :  { %v613_v33 = vmul.f32 %v564_v46, %v501_v25 }
 0x1a3   :  { %v491_v42 = vpop.f32.mrf.mxu2 }
 0x1a4   :  { %v628_v24 = vadd.f32 %v627_v31, %v613_v33  ;;  %v492_v46 = vadd.f32 %v491_v42, %v395_v19 }
 0x1a6   :  { %v629_v40 = vadd.f32 %v628_v24, %v614_v35  ;;  %v509_v51 = vmax.f32 %v492_v46, 0.0  ;;  %v604_v55 = vpop.permute.xlu2 %603 }
 0x1a8   :  { %v630_v44 = vadd.f32 %v629_v40, %v615_v39  ;;  %v621_v56 = vmul.f32 %v604_v55, %v509_v51 }
 0x1aa   :  { %v631_v45 = vadd.f32 %v630_v44, %v616_v23 }
 0x1ac   :  { %v632_v49 = vadd.f32 %v631_v45, %v617_v26 }
 0x1ae   :  { %v633_v50 = vadd.f32 %v632_v49, %v618_v47 }
 0x1b0   :  { %v634_v54 = vadd.f32 %v633_v50, %v619_v41 }
 0x1b2   :  { %v635_v57 = vadd.f32 %v634_v54, %v620_v53 }
 0x1b4   :  { %v636_v58 = vadd.f32 %v635_v57, %v621_v56 }
 0x1b6   :  { %v637_v59 = vrot.slane %v636_v58, 4 }
 0x1b8   :  { %v638_v60 = vadd.f32 %v637_v59, %v636_v58 }
 0x1ba   :  { %v639_v61 = vrot.slane %v638_v60, 2 }
 0x1bc   :  { %v640_v62 = vadd.f32 %v639_v61, %v638_v60 }
 0x1be   :  { %v641_v63 = vrot.slane %v640_v62, 1 }
 0x1c0   :  { %v642_v1 = vadd.f32 %v641_v63, %v640_v62 }
 0x1c2   :  { %v645_v2 = vadd.f32 %v644_v0, %v642_v1 }
 0x1c4   :  { %v754_v3 = vmul.f32 -1.442695, %v645_v2 }
 0x1c6   :  { %785 = vpow2.f32 %v754_v3 }
 0x1cc   :  { %v786_v4 = vpop.eup %785 }
 0x1cd   :  { %v649_v5 = vadd.f32 1.0, %v786_v4 }
 0x1cf   :  { %787 = vrcp.f32 %v649_v5  ;;  %v661_v9 = vand.u32 2147483648, %v649_v5  ;;  %v659_v11 = vand.u32 2147483647, %v649_v5  ;;  %vm655_vm3 = vweird.f32 %v649_v5 }
 0x1d1   :  { %v662_v13 = vor.u32 1.1754944e-38, %v661_v9  ;;  %vm660_vm5 = vcmp.eq.f32.partialorder %v659_v11, 8.507059e+37 }
 0x1d5   :  { %v788_v6 = vpop.eup %787 }
 0x1d6   :  { %v651_v7 = vmul.f32 %v788_v6, %v649_v5  ;;  %vm656_vm2 = vweird.f32 %v788_v6 }
 0x1d7   :  { %vm657_vm4 = vmor %vm655_vm3, %vm656_vm2 }
 0x1d8   :  { %v652_v8 = vsub.f32 1.0, %v651_v7 }
 0x1da   :  { %v653_v10 = vmul.f32 %v788_v6, %v652_v8 }
 0x1dc   :  { %v654_v12 = vadd.f32 %v788_v6, %v653_v10 }
 0x1de   :  { %v658_v14 = vsel %vm657_vm4, %v788_v6, %v654_v12 }
 0x1df   :  { %v663_v15 = vsel %vm660_vm5, %v662_v13, %v658_v14 }
 0x1e0   :  { %665 = vst [vmem:[#allocation3] sm:$0x1] %v663_v15 }
 0x1e1   :  { %676 = dma.vmem_to_hbm [thread:$0]  %s672_s29, 16, %s674_s6, [#allocation4]  }
 0x1e2   :  { %813 = dma.done.wait [#allocation4], 16  }
 0x1e3   :  { %814 = vsyncadd [#allocation4], 4294967280 }
 0x1e4   :  { %681 = vsyncpa [#allocation4], 1 }

</bundles_post_ra>
